<compile_context>
chip_gen: v7x
topology: tpu7x:2x2x1
jax: 0.10.0
libtpu: 0.0.40
codegen_flags: <defaults>
</compile_context>

<pallas_src>
import functools

import jax
import jax.numpy as jnp
from jax.experimental import pallas as pl
from jax.experimental.pallas import tpu as pltpu


# ----------------------------------------------------------------------------
# Kernel
# ----------------------------------------------------------------------------
def _mlp_kernel(xyt_ref, w0_ref, wrest_ref, ball_ref, out_ref,
                *, d_in, hidden, d_out, w_offs, b_offs):
    """One batch tile of the 5-layer MLP, batch on lanes.

    xyt_ref:   (d_in, tn)   f32   concatenated [x; y] features, transposed
    w0_ref:    (hidden, d_in) f32 first-layer weight, (out, in)
    wrest_ref: (packed, hidden) bf16  W1..W4 stacked along rows
    ball_ref:  (packed, 1)  f32   b0..b4 stacked along rows
    out_ref:   (d_out, tn)  f32   lane-dense output
    """
    H = hidden
    xy = xyt_ref[...].astype(jnp.float32)                       # (d_in, tn)

    # ---- Layer 0: tiny contraction dim -> VPU broadcast MACs, bias folded in.
    acc = (w0_ref[:, 0:1] * xy[0:1, :]
           + ball_ref[b_offs[0]:b_offs[0] + H, :])              # (H, tn)
    for f in range(1, d_in):
        acc = acc + w0_ref[:, f:f + 1] * xy[f:f + 1, :]
    h = jnp.maximum(acc, 0.0)                                   # (H, tn) f32

    # ---- Layers 1..3: bf16 MXU matmul, f32 accumulate, fused bias + ReLU.
    for l in range(1, 4):
        w = wrest_ref[w_offs[l - 1]:w_offs[l - 1] + H, :]       # (H, H) bf16
        b = ball_ref[b_offs[l]:b_offs[l] + H, :]                # (H, 1) f32
        h = jnp.maximum(
            jnp.dot(w, h.astype(jnp.bfloat16),
                    preferred_element_type=jnp.float32) + b, 0.0)

    # ---- Layer 4: linear output, lane-dense store.
    w4 = wrest_ref[w_offs[3]:w_offs[3] + d_out, :]              # (d_out, H) bf16
    b4 = ball_ref[b_offs[4]:b_offs[4] + d_out, :]               # (d_out, 1) f32
    out_ref[...] = (jnp.dot(w4, h.astype(jnp.bfloat16),
                            preferred_element_type=jnp.float32) + b4
                    ).astype(out_ref.dtype)


# ----------------------------------------------------------------------------
# Host-side helpers
# ----------------------------------------------------------------------------
def _round_up(a, b):
    return -(-a // b) * b


def _pack_rows(mats, row_align=8):
    """Stack 2-D arrays along rows, padding each block to `row_align` rows.

    Returns (packed_array, offsets) where offsets[i] is the start row of block i.
    """
    blocks, offsets, off = [], [], 0
    for m in mats:
        rows = m.shape[0]
        rows_pad = _round_up(rows, row_align)
        pad = rows_pad - rows
        blocks.append(jnp.pad(m, ((0, pad), (0, 0))) if pad else m)
        offsets.append(off)
        off += rows_pad
    return jnp.concatenate(blocks, axis=0), tuple(offsets)


def _num_tensorcores():
    """Best-effort TensorCore-per-device count (only affects tiling heuristics)."""
    try:
        d = jax.devices()[0]
        nc = getattr(d, "num_cores", None)
        if isinstance(nc, int) and nc > 0:
            return nc
        kind = str(getattr(d, "device_kind", "")).lower()
        if "lite" in kind or "v5e" in kind or "v6e" in kind or "v6" in kind:
            return 1
        if any(tag in kind for tag in ("v4", "v5p", "v7")):
            return 2
    except Exception:
        pass
    return 1


def _choose_tiling(n, num_cores, cap=16384):
    """Pick (tile_n, padded_batch). Fat single tile on 1-TC chips; an even,
    equal split across cores on multi-TC chips. Batch is padded UP to a
    multiple of the tile (no divisor constraint)."""
    n128 = _round_up(max(n, 1), 128)
    if num_cores <= 1:
        tile = min(cap, n128)
    else:
        tile = min(cap, max(128, _round_up(-(-n128 // num_cores), 128)))
    n_pad = _round_up(n128, tile)
    return tile, n_pad


# ----------------------------------------------------------------------------
# Forward wrapper
# ----------------------------------------------------------------------------
def pinn_nn_forward(x, y, params, *, tile_n=None):
    """params: list of (W, b) with W shape (in, out), b shape (1, out) (nn.Linear style)."""
    n, dx = x.shape
    dy = y.shape[1]
    d_in = dx + dy
    hidden = params[0][0].shape[1]
    d_out = params[-1][0].shape[1]

    # Kernel layout: weights (out, in), biases (out, 1).
    wk = [w.T for (w, _) in params]
    bk = [b.reshape(-1, 1).astype(jnp.float32) for (_, b) in params]

    w0 = wk[0].astype(jnp.float32)                        # (hidden, d_in) stays f32 (VPU)
    wrest, w_offs = _pack_rows([w.astype(jnp.bfloat16) for w in wk[1:]],
                               row_align=16)              # bf16 MXU operands
    ball, b_offs = _pack_rows(bk, row_align=8)            # f32 biases

    num_tc = _num_tensorcores()
    if tile_n is None:
        tile_n, n_pad = _choose_tiling(n, num_tc)
    else:
        tile_n = _round_up(tile_n, 128)
        n_pad = _round_up(max(n, 1), tile_n)

    # Single host-side concat + transpose + pad (XLA fuses these).
    xyt = jnp.pad(jnp.concatenate((x, y), axis=-1).astype(jnp.float32).T,
                  ((0, 0), (0, n_pad - n)))               # (d_in, n_pad)

    kernel = functools.partial(
        _mlp_kernel, d_in=d_in, hidden=hidden, d_out=d_out,
        w_offs=w_offs, b_offs=b_offs)

    out_t = pl.pallas_call(
        kernel,
        out_shape=jax.ShapeDtypeStruct((d_out, n_pad), jnp.float32),
        grid=(n_pad // tile_n,),
        in_specs=[
            pl.BlockSpec((d_in, tile_n), lambda i: (0, i)),
            pl.BlockSpec(w0.shape, lambda i: (0, 0)),
            pl.BlockSpec(wrest.shape, lambda i: (0, 0)),
            pl.BlockSpec(ball.shape, lambda i: (0, 0)),
        ],
        out_specs=pl.BlockSpec((d_out, tile_n), lambda i: (0, i)),
        compiler_params=pltpu.CompilerParams(
            dimension_semantics=("parallel",),
            vmem_limit_bytes=48 * 1024 * 1024),
    )(xyt, w0, wrest, ball)

    return out_t[:, :n].T                                 # (n, d_out)


# ----------------------------------------------------------------------------
# Reference + init
# ----------------------------------------------------------------------------
def init_params(key, input_size, hidden_size, output_size, layer_num=5):
    """nn.Linear-style init (uniform +-1/sqrt(fan_in)); W stored (in, out), b (1, out)."""
    sizes = []
    for i in range(layer_num):
        if i == 0:
            sizes.append((input_size, hidden_size))
        elif i == layer_num - 1:
            sizes.append((hidden_size, output_size))
        else:
            sizes.append((hidden_size, hidden_size))

    params = []
    for (fan_in, fan_out) in sizes:
        key, kw, kb = jax.random.split(key, 3)
        bound = 1.0 / jnp.sqrt(jnp.float32(fan_in))
        w = jax.random.uniform(kw, (fan_in, fan_out), jnp.float32, -bound, bound)
        b = jax.random.uniform(kb, (1, fan_out), jnp.float32, -bound, bound)
        params.append((w, b))
    return params


def pinn_nn_reference(x, y, params, *, mxu_bf16=False):
    """Pure-JAX reference. mxu_bf16=True emulates the kernel's bf16 MXU operands."""
    h = jnp.concatenate((x, y), axis=-1).astype(jnp.float32)
    for i, (w, b) in enumerate(params):
        if mxu_bf16 and i > 0:
            h = jnp.dot(h.astype(jnp.bfloat16), w.astype(jnp.bfloat16),
                        preferred_element_type=jnp.float32) + b
        else:
            h = jnp.dot(h, w, precision=jax.lax.Precision.HIGHEST) + b
        if i < len(params) - 1:
            h = jnp.maximum(h, 0.0)
    return h


# ----------------------------------------------------------------------------
# Demo / correctness check
# ----------------------------------------------------------------------------
if __name__ == "__main__":
    key = jax.random.PRNGKey(0)

    # PINN-style problem: x and y are 1-D coordinates -> input_size = 2.
    batch = 256
    x_dim, y_dim = 1, 1
    input_size = x_dim + y_dim
    hidden_size = 32
    output_size = 1

    key, kx, ky, kp = jax.random.split(key, 4)
    x = jax.random.normal(kx, (batch, x_dim), jnp.float32)
    y = jax.random.normal(ky, (batch, y_dim), jnp.float32)
    params = init_params(kp, input_size, hidden_size, output_size)

    out = pinn_nn_forward(x, y, params)
    out = jax.block_until_ready(out)
    assert out.shape == (batch, output_size)

    # Tight check against a reference that matches the kernel's bf16 MXU operands.
    ref_bf16 = pinn_nn_reference(x, y, params, mxu_bf16=True)
    assert jnp.allclose(out, ref_bf16, atol=2e-3, rtol=2e-3), \
        "mismatch vs bf16-matched reference"

    # Looser check against the full-f32 reference (bf16 MXU tolerance).
    ref_f32 = pinn_nn_reference(x, y, params, mxu_bf16=False)
    assert jnp.allclose(out, ref_f32, atol=3e-2, rtol=3e-2), \
        "mismatch vs f32 reference"

    print("KERNEL_OK")
</pallas_src>

<mosaic_0001>
module attributes {stable_mosaic.version = 11 : i64} {
  func.func @_mlp_kernel(%arg0: i32, %arg1: memref<2x256xf32, #tpu.memory_space<vmem>>, %arg2: memref<32x2xf32, #tpu.memory_space<vmem>>, %arg3: memref<112x32xbf16, #tpu.memory_space<vmem>>, %arg4: memref<136x1xf32, #tpu.memory_space<vmem>>, %arg5: memref<1x256xf32, #tpu.memory_space<vmem>>) attributes {dimension_semantics = [#tpu.dimension_semantics<parallel>], iteration_bounds = array<i64: 1>, scalar_prefetch = 0 : i64, scratch_operands = 0 : i64, tpu.core_type = #tpu.core_type<tc>, window_params = [{transform_indices = @transform_0, window_bounds = array<i64: 2, 256>}, {pipeline_mode = #tpu.pipeline_mode<synchronous>, transform_indices = @transform_1, window_bounds = array<i64: 32, 2>}, {pipeline_mode = #tpu.pipeline_mode<synchronous>, transform_indices = @transform_2, window_bounds = array<i64: 112, 32>}, {pipeline_mode = #tpu.pipeline_mode<synchronous>, transform_indices = @transform_3, window_bounds = array<i64: 136, 1>}, {transform_indices = @transform_4, window_bounds = array<i64: 1, 256>}]} {
    %c0 = arith.constant 0 : index
    %c0_0 = arith.constant 0 : index
    %0 = vector.load %arg1[%c0, %c0_0] : memref<2x256xf32, #tpu.memory_space<vmem>>, vector<2x256xf32>
    %c0_1 = arith.constant 0 : index
    %c0_2 = arith.constant 0 : index
    %1 = vector.load %arg2[%c0_1, %c0_2] : memref<32x2xf32, #tpu.memory_space<vmem>>, vector<32x1xf32>
    %2 = vector.extract_strided_slice %0 {offsets = [0, 0], sizes = [1, 256], strides = [1, 1]} : vector<2x256xf32> to vector<1x256xf32>
    %3 = vector.broadcast %1 : vector<32x1xf32> to vector<32x256xf32>
    %4 = vector.broadcast %2 : vector<1x256xf32> to vector<32x256xf32>
    %5 = arith.mulf %3, %4 : vector<32x256xf32>
    %c0_3 = arith.constant 0 : index
    %c0_4 = arith.constant 0 : index
    %6 = vector.load %arg4[%c0_3, %c0_4] : memref<136x1xf32, #tpu.memory_space<vmem>>, vector<32x1xf32>
    %7 = vector.broadcast %6 : vector<32x1xf32> to vector<32x256xf32>
    %8 = arith.addf %5, %7 : vector<32x256xf32>
    %c0_5 = arith.constant 0 : index
    %c1 = arith.constant 1 : index
    %9 = vector.load %arg2[%c0_5, %c1] : memref<32x2xf32, #tpu.memory_space<vmem>>, vector<32x1xf32>
    %10 = vector.extract_strided_slice %0 {offsets = [1, 0], sizes = [1, 256], strides = [1, 1]} : vector<2x256xf32> to vector<1x256xf32>
    %11 = vector.broadcast %9 : vector<32x1xf32> to vector<32x256xf32>
    %12 = vector.broadcast %10 : vector<1x256xf32> to vector<32x256xf32>
    %13 = arith.mulf %11, %12 : vector<32x256xf32>
    %14 = arith.addf %8, %13 : vector<32x256xf32>
    %cst = arith.constant 0.000000e+00 : f32
    %15 = vector.broadcast %cst : f32 to vector<32x256xf32>
    %16 = arith.maximumf %14, %15 : vector<32x256xf32>
    %c0_6 = arith.constant 0 : index
    %c0_7 = arith.constant 0 : index
    %17 = vector.load %arg3[%c0_6, %c0_7] : memref<112x32xbf16, #tpu.memory_space<vmem>>, vector<32x32xbf16>
    %c32 = arith.constant 32 : index
    %c0_8 = arith.constant 0 : index
    %18 = vector.load %arg4[%c32, %c0_8] : memref<136x1xf32, #tpu.memory_space<vmem>>, vector<32x1xf32>
    %19 = arith.truncf %16 : vector<32x256xf32> to vector<32x256xbf16>
    %cst_9 = arith.constant dense<0.000000e+00> : vector<32x256xf32>
    %20 = tpu.matmul %17, %19, %cst_9 {dimension_numbers = #tpu.dot_dimension_numbers<[1], [0], [0], [1], [0, 0, 1, 1], [], []>} : vector<32x32xbf16>, vector<32x256xbf16>, vector<32x256xf32> -> vector<32x256xf32>
    %21 = vector.broadcast %18 : vector<32x1xf32> to vector<32x256xf32>
    %22 = arith.addf %20, %21 : vector<32x256xf32>
    %cst_10 = arith.constant 0.000000e+00 : f32
    %23 = vector.broadcast %cst_10 : f32 to vector<32x256xf32>
    %24 = arith.maximumf %22, %23 : vector<32x256xf32>
    %c32_11 = arith.constant 32 : index
    %c0_12 = arith.constant 0 : index
    %25 = vector.load %arg3[%c32_11, %c0_12] : memref<112x32xbf16, #tpu.memory_space<vmem>>, vector<32x32xbf16>
    %c64 = arith.constant 64 : index
    %c0_13 = arith.constant 0 : index
    %26 = vector.load %arg4[%c64, %c0_13] : memref<136x1xf32, #tpu.memory_space<vmem>>, vector<32x1xf32>
    %27 = arith.truncf %24 : vector<32x256xf32> to vector<32x256xbf16>
    %cst_14 = arith.constant dense<0.000000e+00> : vector<32x256xf32>
    %28 = tpu.matmul %25, %27, %cst_14 {dimension_numbers = #tpu.dot_dimension_numbers<[1], [0], [0], [1], [0, 0, 1, 1], [], []>} : vector<32x32xbf16>, vector<32x256xbf16>, vector<32x256xf32> -> vector<32x256xf32>
    %29 = vector.broadcast %26 : vector<32x1xf32> to vector<32x256xf32>
    %30 = arith.addf %28, %29 : vector<32x256xf32>
    %cst_15 = arith.constant 0.000000e+00 : f32
    %31 = vector.broadcast %cst_15 : f32 to vector<32x256xf32>
    %32 = arith.maximumf %30, %31 : vector<32x256xf32>
    %c64_16 = arith.constant 64 : index
    %c0_17 = arith.constant 0 : index
    %33 = vector.load %arg3[%c64_16, %c0_17] : memref<112x32xbf16, #tpu.memory_space<vmem>>, vector<32x32xbf16>
    %c96 = arith.constant 96 : index
    %c0_18 = arith.constant 0 : index
    %34 = vector.load %arg4[%c96, %c0_18] : memref<136x1xf32, #tpu.memory_space<vmem>>, vector<32x1xf32>
    %35 = arith.truncf %32 : vector<32x256xf32> to vector<32x256xbf16>
    %cst_19 = arith.constant dense<0.000000e+00> : vector<32x256xf32>
    %36 = tpu.matmul %33, %35, %cst_19 {dimension_numbers = #tpu.dot_dimension_numbers<[1], [0], [0], [1], [0, 0, 1, 1], [], []>} : vector<32x32xbf16>, vector<32x256xbf16>, vector<32x256xf32> -> vector<32x256xf32>
    %37 = vector.broadcast %34 : vector<32x1xf32> to vector<32x256xf32>
    %38 = arith.addf %36, %37 : vector<32x256xf32>
    %cst_20 = arith.constant 0.000000e+00 : f32
    %39 = vector.broadcast %cst_20 : f32 to vector<32x256xf32>
    %40 = arith.maximumf %38, %39 : vector<32x256xf32>
    %c96_21 = arith.constant 96 : index
    %c0_22 = arith.constant 0 : index
    %41 = vector.load %arg3[%c96_21, %c0_22] : memref<112x32xbf16, #tpu.memory_space<vmem>>, vector<1x32xbf16>
    %c128 = arith.constant 128 : index
    %c0_23 = arith.constant 0 : index
    %42 = vector.load %arg4[%c128, %c0_23] : memref<136x1xf32, #tpu.memory_space<vmem>>, vector<1x1xf32>
    %43 = arith.truncf %40 : vector<32x256xf32> to vector<32x256xbf16>
    %cst_24 = arith.constant dense<0.000000e+00> : vector<1x256xf32>
    %44 = tpu.matmul %41, %43, %cst_24 {dimension_numbers = #tpu.dot_dimension_numbers<[1], [0], [0], [1], [0, 0, 1, 1], [], []>} : vector<1x32xbf16>, vector<32x256xbf16>, vector<1x256xf32> -> vector<1x256xf32>
    %45 = vector.broadcast %42 : vector<1x1xf32> to vector<1x256xf32>
    %46 = arith.addf %44, %45 : vector<1x256xf32>
    %c0_25 = arith.constant 0 : index
    %c0_26 = arith.constant 0 : index
    %47 = vector.load %arg5[%c0_25, %c0_26] : memref<1x256xf32, #tpu.memory_space<vmem>>, vector<1x256xf32>
    tpu.vector_store %arg5[%c0_25, %c0_26], %46 {strides = array<i32>} : memref<1x256xf32, #tpu.memory_space<vmem>>, vector<1x256xf32>,
    return
  }
  func.func @transform_0(%arg0: i32) -> (i32, i32) {
    %c0_i32 = arith.constant 0 : i32
    %c0_i32_0 = arith.constant 0 : i32
    return %c0_i32, %arg0 : i32, i32
  }
  func.func @transform_1(%arg0: i32) -> (i32, i32) {
    %c0_i32 = arith.constant 0 : i32
    %c0_i32_0 = arith.constant 0 : i32
    %c0_i32_1 = arith.constant 0 : i32
    return %c0_i32, %c0_i32_0 : i32, i32
  }
  func.func @transform_2(%arg0: i32) -> (i32, i32) {
    %c0_i32 = arith.constant 0 : i32
    %c0_i32_0 = arith.constant 0 : i32
    %c0_i32_1 = arith.constant 0 : i32
    return %c0_i32, %c0_i32_0 : i32, i32
  }
  func.func @transform_3(%arg0: i32) -> (i32, i32) {
    %c0_i32 = arith.constant 0 : i32
    %c0_i32_0 = arith.constant 0 : i32
    %c0_i32_1 = arith.constant 0 : i32
    return %c0_i32, %c0_i32_0 : i32, i32
  }
  func.func @transform_4(%arg0: i32) -> (i32, i32) {
    %c0_i32 = arith.constant 0 : i32
    %c0_i32_0 = arith.constant 0 : i32
    return %c0_i32, %arg0 : i32, i32
  }
}

</mosaic_0001>

<bundles_post_ra>
// kernel: tpu_custom_call.1
= control target key start
LH: loop header
LB: loop body
LE: loop exit
PB: predicated region body
PF: predicated region fallthrough
CT: control target
= control target key end

     0   :  { %v636_v2 = vmov 0   ;;  %s792_s0 = inlined_call_operand.vmem [shape: f32[2,256], index: 0, kind: input, shape index: {}]   ;;  %s793_s1 = inlined_call_operand.vmem [shape: f32[32,2], index: 1, kind: input, shape index: {}]   ;;  %s794_s2 = inlined_call_operand.vmem [shape: bf16[112,32], index: 2, kind: input, shape index: {}]   ;;  %s795_s3 = inlined_call_operand.vmem [shape: f32[136,1], index: 3, kind: input, shape index: {}]   ;;  %s796_s4 = inlined_call_operand.hbm [shape: f32[1,256], index: 4, kind: output, shape index: {}]  }
   0x1   :  { %v71_v0 = vld [vmem:[%s795_s3] sm:$0xff]  ;;  %599 = vset.pattern.permute.xlu1 %v636_v2  ;;  %598 = vset.pattern.permute.xlu0 %v636_v2  ;;  %v72_v3 = vld [vmem:[%s795_s3 + $0x8] sm:$0xff]  ;;  %v23_v5 = vld [vmem:[%s793_s1 + $0x18] sm:$0xff] }
   0x2   :  { %v20_v1 = vld [vmem:[%s793_s1] sm:$0xff]  ;;  %77 = vperm.xlu1 %599, %v71_v0   ;;  %v21_v4 = vld [vmem:[%s793_s1 + $0x8] sm:$0xff]  ;;  %242 = vmatprep.mubr.bf16.mxu0 %v636_v2 }
   0x3   :  { %26 = vperm.xlu0 %598, %v20_v1   ;;  %351 = vmatprep.mubr.bf16.mxu1 %v636_v2 }
   0x6   :  { %82 = vperm.xlu1 %599, %v72_v3  }
   0x7   :  { %31 = vperm.xlu0 %598, %v21_v4  }
   0x8   :  { %9 = vsyncpa [#allocation3], 0  ;;  %v637_v6 = vmov 1   ;;  %v22_v7 = vld [vmem:[%s793_s1 + $0x10] sm:$0xff]  ;;  %v74_v9 = vld [vmem:[%s795_s3 + $0x18] sm:$0xff]  ;;  %v45_v23 = vlaneseq  ;;  %vm203_vm0 = vcmask 261120  }
   0x9   :  { %v73_v8 = vld [vmem:[%s795_s3 + $0x10] sm:$0xff]  ;;  %v165_v10 = vld [vmem:[%s795_s3 + $0x20] sm:$0xff]  ;;  %v166_v11 = vld [vmem:[%s795_s3 + $0x28] sm:$0xff]  ;;  %s639_s17 = smov [#allocation2]  }
   0xa   :  { %600 = vset.pattern.permute.xlu1 %v637_v6  ;;  %v167_v12 = vld [vmem:[%s795_s3 + $0x30] sm:$0xff]  ;;  %v275_v13 = vld [vmem:[%s795_s3 + $0x40] sm:$0xff]  ;;  %v168_v14 = vld [vmem:[%s795_s3 + $0x38] sm:$0xff]  ;;  %v736_v24 = vshrl.u32 %v45_v23, 7  ;;  %s573_s18 = sshll.u32 %s639_s17, 4  ;;  %vm564_vm1 = vcmp.lt.s32.totalorder %v45_v23, 256  ;;  %s574_s18 = int_to_ptr.vmem [resolvable:$true] %s573_s18 }
   0xb   :  { %41 = vperm.xlu0 %598, %v23_v5   ;;  %108 = vperm.xlu1 %600, %v21_v4   ;;  %v277_v15 = vld [vmem:[%s795_s3 + $0x50] sm:$0xff]  ;;  %v276_v16 = vld [vmem:[%s795_s3 + $0x48] sm:$0xff]  ;;  %v384_v17 = vld [vmem:[%s795_s3 + $0x60] sm:$0xff]  ;;  %p617_p1 = scmp.lt.s32.totalorder %s574_s18, %s574_s18 }
   0xc   :  { %v278_v18 = vld [vmem:[%s795_s3 + $0x58] sm:$0xff]  ;;  %v386_v19 = vld [vmem:[%s795_s3 + $0x70] sm:$0xff]  ;;  %v385_v20 = vld [vmem:[%s795_s3 + $0x68] sm:$0xff]  ;;  %v47_v25 = vsub.s32 0, %v736_v24  ;;  %v51_v26 = vsub.s32 2, %v736_v24  ;;  %v121_v28 = vsub.s32 1, %v736_v24 }
   0xd   :  { %v490_v21 = vld [vmem:[%s795_s3 + $0x80] sm:$0x1]  ;;  %v387_v22 = vld [vmem:[%s795_s3 + $0x78] sm:$0xff]  ;;  %v125_v29 = vsub.s32 3, %v736_v24 }
   0xe   :  { %v19_v27 = vld [vmem:[%s792_s0] sm:$0xf] }
   0xf   :  { %602 = vset.pattern.permute.xlu0 %v637_v6  ;;  %601 = vset.pattern.permute.xlu1 %v636_v2  ;;  %v48_v32 = vrot.slane %v19_v27, %v47_v25  ;;  %v52_v33 = vrot.slane %v19_v27, %v51_v26  ;;  %v122_v34 = vrot.slane %v19_v27, %v121_v28 }
  0x10   :  { %104 = vperm.xlu0 %602, %v20_v1   ;;  %36 = vperm.xlu1 %601, %v22_v7   ;;  %v126_v35 = vrot.slane %v19_v27, %v125_v29 }
  0x11   :  { %v58_v38 = vrot.slane %v48_v32, %v47_v25  ;;  %v62_v39 = vrot.slane %v52_v33, %v47_v25  ;;  %v132_v40 = vrot.slane %v122_v34, %v121_v28  ;;  %v606_v33 = vld [vmem:[%s794_s2] sm:$0xff]   ;;  %v607_v34 = vld [vmem:[%s794_s2 + $0x8] sm:$0xff]  }
  0x12   :  { %v136_v41 = vrot.slane %v126_v35, %v121_v28 }
  0x14   :  { %112 = vperm.xlu0 %602, %v22_v7   ;;  %87 = vperm.xlu1 %601, %v73_v8  }
  0x18   :  { %605 = vset.pattern.permute.xlu0 %v636_v2  ;;  %92 = vperm.xlu1 %601, %v74_v9  }
  0x19   :  { %180 = vperm.xlu0 %605, %v166_v11  }
  0x1c   :  { %603 = vset.pattern.permute.xlu1 %v637_v6 }
  0x1d   :  { %116 = vperm.xlu1 %603, %v23_v5   ;;  %285 = vperm.xlu0 %605, %v275_v13  }
  0x21   :  { %604 = vset.pattern.permute.xlu1 %v636_v2  ;;  %295 = vperm.xlu0 %605, %v277_v15  }
  0x22   :  { %175 = vperm.xlu1 %604, %v165_v10  }
  0x25   :  { %394 = vperm.xlu0 %605, %v384_v17  }
  0x26   :  { %185 = vperm.xlu1 %604, %v167_v12  }
  0x29   :  { %404 = vperm.xlu0 %605, %v386_v19  }
  0x2a   :  { %190 = vperm.xlu1 %604, %v168_v14  }
  0x2d   :  { %497 = vperm.xlu0 %605, %v490_v21  }
  0x2e   :  { %290 = vperm.xlu1 %604, %v276_v16  }
  0x32   :  { %300 = vperm.xlu1 %604, %v278_v18  }
  0x36   :  { %399 = vperm.xlu1 %604, %v385_v20  }
  0x3a   :  { %409 = vperm.xlu1 %604, %v387_v22  }
  0x81   :  { %v78_v30 = vpop.permute.xlu1 %77 }
  0x82   :  { %v27_v31 = vpop.permute.xlu0 %26 }
  0x83   :  { %v63_v45 = vmul.f32 %v58_v38, %v27_v31  ;;  %v64_v46 = vmul.f32 %v62_v39, %v27_v31 }
  0x85   :  { %v83_v36 = vpop.permute.xlu1 %82  ;;  %v95_v52 = vadd.f32 %v78_v30, %v63_v45  ;;  %v96_v53 = vadd.f32 %v78_v30, %v64_v46 }
  0x86   :  { %v32_v37 = vpop.permute.xlu0 %31 }
  0x87   :  { %v65_v42 = vmul.f32 %v58_v38, %v32_v37  ;;  %v66_v43 = vmul.f32 %v62_v39, %v32_v37 }
  0x89   :  { %v97_v50 = vadd.f32 %v83_v36, %v65_v42  ;;  %v98_v51 = vadd.f32 %v83_v36, %v66_v43 }
  0x8a   :  { %v42_v44 = vpop.permute.xlu0 %41  ;;  %v109_v47 = vpop.permute.xlu1 %108 }
  0x8b   :  { %v139_v48 = vmul.f32 %v132_v40, %v109_v47  ;;  %v140_v49 = vmul.f32 %v136_v41, %v109_v47  ;;  %v69_v14 = vmul.f32 %v58_v38, %v42_v44  ;;  %v70_v15 = vmul.f32 %v62_v39, %v42_v44 }
  0x8d   :  { %v147_v55 = vadd.f32 %v139_v48, %v97_v50  ;;  %v148_v59 = vadd.f32 %v140_v49, %v98_v51 }
  0x8f   :  { %v105_v54 = vpop.permute.xlu0 %104  ;;  %v37_v58 = vpop.permute.xlu1 %36  ;;  %v156_v0 = vmax.f32 %v148_v59, 0.0  ;;  %v155_v3 = vmax.f32 %v147_v55, 0.0 }
  0x90   :  { %v137_v56 = vmul.f32 %v132_v40, %v105_v54  ;;  %v138_v57 = vmul.f32 %v136_v41, %v105_v54  ;;  %v67_v7 = vmul.f32 %v58_v38, %v37_v58  ;;  %v68_v8 = vmul.f32 %v62_v39, %v37_v58 }
  0x92   :  { %v145_v60 = vadd.f32 %v137_v56, %v95_v52  ;;  %v146_v61 = vadd.f32 %v138_v57, %v96_v53 }
  0x93   :  { %v88_v62 = vpop.permute.xlu1 %87  ;;  %v113_v4 = vpop.permute.xlu0 %112 }
  0x94   :  { %v154_v63 = vmax.f32 %v146_v61, 0.0  ;;  %v153_v1 = vmax.f32 %v145_v60, 0.0  ;;  %v99_v10 = vadd.f32 %v88_v62, %v67_v7  ;;  %v100_v11 = vadd.f32 %v88_v62, %v68_v8 }
  0x95   :  { %v141_v12 = vmul.f32 %v132_v40, %v113_v4  ;;  %v142_v13 = vmul.f32 %v136_v41, %v113_v4  ;;  %v608_v4 = vld [vmem:[%s794_s2 + $0x10] sm:$0xff]  }
  0x96   :  { %v170_v5 = vpack.c.bf16 %v156_v0, %v154_v63  ;;  %v169_v6 = vpack.c.bf16 %v155_v3, %v153_v1 }
  0x97   :  { %v93_v9 = vpop.permute.xlu1 %92  ;;  %v149_v16 = vadd.f32 %v141_v12, %v99_v10  ;;  %v150_v17 = vadd.f32 %v142_v13, %v100_v11 }
  0x98   :  { %210 = vmatprep.subr.bf16.mxu0 %v170_v5  ;;  %v101_v19 = vadd.f32 %v93_v9, %v69_v14  ;;  %v102_v20 = vadd.f32 %v93_v9, %v70_v15  ;;  %v181_v39 = vpop.permute.xlu0 %180  ;;  %v609_v5 = vld [vmem:[%s794_s2 + $0x18] sm:$0xff]  }
  0x99   :  { %211 = vmatpush1.bf16.msra.mxu0 %v169_v6  ;;  %v157_v27 = vmax.f32 %v149_v16, 0.0  ;;  %v158_v28 = vmax.f32 %v150_v17, 0.0 }
  0x9c   :  { %v117_v18 = vpop.permute.xlu1 %116  ;;  %v286_v6 = vpop.permute.xlu0 %285 }
  0x9d   :  { %v143_v21 = vmul.f32 %v132_v40, %v117_v18  ;;  %v144_v22 = vmul.f32 %v136_v41, %v117_v18 }
  0x9f   :  { %v151_v25 = vadd.f32 %v143_v21, %v101_v19  ;;  %v152_v26 = vadd.f32 %v144_v22, %v102_v20 }
  0xa0   :  { %v296_v21 = vpop.permute.xlu0 %295 }
  0xa1   :  { %v159_v29 = vmax.f32 %v151_v25, 0.0  ;;  %v160_v30 = vmax.f32 %v152_v26, 0.0  ;;  %v176_v35 = vpop.permute.xlu1 %175 }
  0xa3   :  { %v172_v31 = vpack.c.bf16 %v160_v30, %v158_v28  ;;  %v171_v32 = vpack.c.bf16 %v159_v29, %v157_v27 }
  0xa5   :  { %212 = vmatprep.subr.bf16.mxu0 %v172_v31  ;;  %v186_v44 = vpop.permute.xlu1 %185 }
  0xa6   :  { %213 = vmatpush1.bf16.msra.mxu0 %v171_v32 }
  0xa9   :  { %583 = vmatmul.mubr.msk.bf16.vlgmr.msra.gmra.mrb[0].mxu0 %vm203_vm0, %v606_v33  ;;  %v191_v55 = vpop.permute.xlu1 %190 }
  0xaa   :  { %252 = vmatprep.mubr.bf16.mxu0 %v636_v2 }
  0xad   :  { %v291_v10 = vpop.permute.xlu1 %290 }
  0xb1   :  { %584 = vmatmul.mubr.msk.bf16.gmra.mrb[4].mxu0 %vm203_vm0, %v607_v34  ;;  %v301_v28 = vpop.permute.xlu1 %300 }
  0xb2   :  { %460 = vmatprep.mubr.bf16.mxu0 %v636_v2 }
 0x17c   :  { %v244_v36 = vpop.f32.mrb[0].mxu0 }
 0x17d   :  { %v245_v37 = vadd.f32 %v244_v36, %v176_v35  ;;  %v246_v38 = vpop.f32.mrb[1].mxu0 }
 0x17e   :  { %v247_v40 = vadd.f32 %v246_v38, %v176_v35  ;;  %v248_v41 = vpop.f32.mrb[2].mxu0 }
 0x17f   :  { %v249_v42 = vadd.f32 %v248_v41, %v181_v39  ;;  %v250_v43 = vpop.f32.mrb[3].mxu0  ;;  %v263_v46 = vmax.f32 %v245_v37, 0.0  ;;  %v611_v41 = vld [vmem:[%s794_s2 + $0x28] sm:$0xff]  }
 0x180   :  { %v251_v45 = vadd.f32 %v250_v43, %v181_v39  ;;  %v264_v48 = vmax.f32 %v247_v40, 0.0  ;;  %v610_v40 = vld [vmem:[%s794_s2 + $0x20] sm:$0xff]  }
 0x181   :  { %v265_v47 = vmax.f32 %v249_v42, 0.0  ;;  %v395_v42 = vpop.permute.xlu0 %394 }
 0x182   :  { %v266_v49 = vmax.f32 %v251_v45, 0.0 }
 0x183   :  { %v279_v50 = vpack.c.bf16 %v265_v47, %v263_v46  ;;  %v400_v46 = vpop.permute.xlu1 %399 }
 0x184   :  { %v254_v51 = vpop.f32.mrb[4].mxu0  ;;  %v280_v52 = vpack.c.bf16 %v266_v49, %v264_v48 }
 0x185   :  { %v255_v53 = vadd.f32 %v254_v51, %v186_v44  ;;  %v256_v54 = vpop.f32.mrb[5].mxu0 }
 0x186   :  { %v257_v56 = vadd.f32 %v256_v54, %v186_v44  ;;  %v258_v57 = vpop.f32.mrb[6].mxu0  ;;  %319 = vmatprep.subr.bf16.mxu1 %v280_v52 }
 0x187   :  { %v259_v58 = vadd.f32 %v258_v57, %v191_v55  ;;  %v260_v59 = vpop.f32.mrb[7].mxu0  ;;  %320 = vmatpush1.bf16.msra.mxu1 %v279_v50  ;;  %v267_v61 = vmax.f32 %v255_v53, 0.0 }
 0x188   :  { %v261_v60 = vadd.f32 %v260_v59, %v191_v55  ;;  %v268_v63 = vmax.f32 %v257_v56, 0.0  ;;  %v405_v56 = vpop.permute.xlu0 %404 }
 0x189   :  { %v269_v62 = vmax.f32 %v259_v58, 0.0 }
 0x18a   :  { %v270_v0 = vmax.f32 %v261_v60, 0.0 }
 0x18b   :  { %v281_v1 = vpack.c.bf16 %v269_v62, %v267_v61  ;;  %v410_v61 = vpop.permute.xlu1 %409 }
 0x18c   :  { %v282_v3 = vpack.c.bf16 %v270_v0, %v268_v63 }
 0x18e   :  { %321 = vmatprep.subr.bf16.mxu1 %v282_v3 }
 0x18f   :  { %322 = vmatpush1.bf16.msra.mxu1 %v281_v1 }
 0x192   :  { %587 = vmatmul.mubr.msk.bf16.vlgmr.msra.gmra.mrb[0].mxu1 %vm203_vm0, %v608_v4 }
 0x193   :  { %361 = vmatprep.mubr.bf16.mxu1 %v636_v2 }
 0x19a   :  { %588 = vmatmul.mubr.msk.bf16.gmra.mrb[4].mxu1 %vm203_vm0, %v609_v5 }
 0x19b   :  { %535 = vmatprep.mubr.bf16.mxu1 %v636_v2 }
 0x265   :  { %v353_v7 = vpop.f32.mrb[0].mxu1 }
 0x266   :  { %v354_v8 = vadd.f32 %v353_v7, %v286_v6  ;;  %v355_v9 = vpop.f32.mrb[1].mxu1 }
 0x267   :  { %v356_v11 = vadd.f32 %v355_v9, %v286_v6  ;;  %v357_v12 = vpop.f32.mrb[2].mxu1 }
 0x268   :  { %v358_v13 = vadd.f32 %v357_v12, %v291_v10  ;;  %v359_v14 = vpop.f32.mrb[3].mxu1  ;;  %v372_v16 = vmax.f32 %v354_v8, 0.0 }
 0x269   :  { %v360_v15 = vadd.f32 %v359_v14, %v291_v10  ;;  %v373_v18 = vmax.f32 %v356_v11, 0.0  ;;  %v489_v10 = vld [vmem:[%s794_s2 + $0x30] sm:$0x1]  ;;  %v638_v11 = vmov 1966171168   ;;  %v498_v14 = vpop.permute.xlu0 %497  ;;  %s612_s2 = scalar_lea.vmem %s574_s18, 32 }
 0x26a   :  { %v374_v17 = vmax.f32 %v358_v13, 0.0  ;;  %v548_v12 = vunpack.c.l.s4 %v638_v11  ;;  %p613_p0 = scmp.ne.s32.totalorder %s574_s18, %s612_s2  ;;  %p618_p2 = scmp.lt.s32.totalorder %s612_s2, %s612_s2 }
 0x26b   :  { %v375_v19 = vmax.f32 %v360_v15, 0.0 }
 0x26c   :  { %v388_v20 = vpack.c.bf16 %v374_v17, %v372_v16  ;;  %v549_v13 = vunpack.c.0.s8 %v548_v12  ;;  %p619_p3 = por %p618_p2, %p617_p1 }
 0x26d   :  { %v389_v22 = vpack.c.bf16 %v375_v19, %v373_v18  ;;  %v363_v25 = vpop.f32.mrb[4].mxu1 }
 0x26e   :  { %v364_v26 = vadd.f32 %v363_v25, %v296_v21  ;;  %v365_v27 = vpop.f32.mrb[5].mxu1  ;;  %v552_v19 = vsub.s32 %v549_v13, %v736_v24  ;;  %p620_p4 = pnand %p619_p3, %p613_p0 }
 0x26f   :  { %v366_v29 = vadd.f32 %v365_v27, %v296_v21  ;;  %v367_v30 = vpop.f32.mrb[6].mxu1  ;;  %428 = vmatprep.subr.bf16.mxu0 %v389_v22 }
 0x270   :  { %v368_v31 = vadd.f32 %v367_v30, %v301_v28  ;;  %v369_v32 = vpop.f32.mrb[7].mxu1  ;;  %429 = vmatpush1.bf16.msra.mxu0 %v388_v20  ;;  %v376_v34 = vmax.f32 %v364_v26, 0.0 }
 0x271   :  { %v370_v33 = vadd.f32 %v369_v32, %v301_v28  ;;  %v377_v36 = vmax.f32 %v366_v29, 0.0 }
 0x272   :  { %v378_v35 = vmax.f32 %v368_v31, 0.0 }
 0x273   :  { %v379_v37 = vmax.f32 %v370_v33, 0.0 }
 0x274   :  { %v390_v38 = vpack.c.bf16 %v378_v35, %v376_v34 }
 0x275   :  { %v391_v39 = vpack.c.bf16 %v379_v37, %v377_v36 }
 0x277   :  { %430 = vmatprep.subr.bf16.mxu0 %v391_v39 }
 0x278   :  { %431 = vmatpush1.bf16.msra.mxu0 %v390_v38 }
 0x27b   :  { %591 = vmatmul.mubr.msk.bf16.vlgmr.msra.gmra.mrb[8].mxu0 %vm203_vm0, %v610_v40 }
 0x27c   :  { %470 = vmatprep.mubr.bf16.mxu0 %v636_v2 }
 0x283   :  { %592 = vmatmul.mubr.msk.bf16.gmra.mrb[12].mxu0 %vm203_vm0, %v611_v41 }
 0x34e   :  { %v462_v43 = vpop.f32.mrb[8].mxu0 }
 0x34f   :  { %v463_v44 = vadd.f32 %v462_v43, %v395_v42  ;;  %v464_v45 = vpop.f32.mrb[9].mxu0 }
 0x350   :  { %v465_v47 = vadd.f32 %v464_v45, %v395_v42  ;;  %v466_v48 = vpop.f32.mrb[10].mxu0 }
 0x351   :  { %v467_v49 = vadd.f32 %v466_v48, %v400_v46  ;;  %v468_v50 = vpop.f32.mrb[11].mxu0  ;;  %v481_v52 = vmax.f32 %v463_v44, 0.0 }
 0x352   :  { %v469_v51 = vadd.f32 %v468_v50, %v400_v46  ;;  %v482_v54 = vmax.f32 %v465_v47, 0.0 }
 0x353   :  { %v483_v53 = vmax.f32 %v467_v49, 0.0 }
 0x354   :  { %v484_v2 = vmax.f32 %v469_v51, 0.0 }
 0x355   :  { %v491_v55 = vpack.c.bf16 %v483_v53, %v481_v52 }
 0x356   :  { %v492_v57 = vpack.c.bf16 %v484_v2, %v482_v54  ;;  %v472_v58 = vpop.f32.mrb[12].mxu0 }
 0x357   :  { %v473_v59 = vadd.f32 %v472_v58, %v405_v56  ;;  %v474_v60 = vpop.f32.mrb[13].mxu0 }
 0x358   :  { %v475_v62 = vadd.f32 %v474_v60, %v405_v56  ;;  %v476_v63 = vpop.f32.mrb[14].mxu0  ;;  %503 = vmatprep.subr.bf16.mxu1 %v492_v57 }
 0x359   :  { %v477_v0 = vadd.f32 %v476_v63, %v410_v61  ;;  %v478_v1 = vpop.f32.mrb[15].mxu0  ;;  %504 = vmatpush1.bf16.msra.mxu1 %v491_v55  ;;  %v485_v4 = vmax.f32 %v473_v59, 0.0 }
 0x35a   :  { %v479_v3 = vadd.f32 %v478_v1, %v410_v61  ;;  %v486_v6 = vmax.f32 %v475_v62, 0.0 }
 0x35b   :  { %v487_v5 = vmax.f32 %v477_v0, 0.0 }
 0x35c   :  { %v488_v7 = vmax.f32 %v479_v3, 0.0 }
 0x35d   :  { %v493_v8 = vpack.c.bf16 %v487_v5, %v485_v4 }
 0x35e   :  { %v494_v9 = vpack.c.bf16 %v488_v7, %v486_v6 }
 0x360   :  { %505 = vmatprep.subr.bf16.mxu1 %v494_v9 }
 0x361   :  { %506 = vmatpush1.bf16.msra.mxu1 %v493_v8 }
 0x364   :  { %593 = vmatmul.mubr.msk.bf16.vlgmr.msra.gmra.mrb[8].mxu1 %vm203_vm0, %v489_v10 }
 0x437   :  { %v537_v15 = vpop.f32.mrb[8].mxu1 }
 0x438   :  { %v538_v16 = vadd.f32 %v537_v15, %v498_v14  ;;  %v539_v17 = vpop.f32.mrb[9].mxu1 }
 0x439   :  { %v540_v18 = vadd.f32 %v539_v17, %v498_v14  ;;  %v541_v20 = vpop.f32.mrb[10].mxu1 }
 0x43a   :  { %v542_v21 = vpop.f32.mrb[11].mxu1 }
 0x43b   :  { %v546_v22 = vcombine.low %v538_v16, %v540_v18 }
 0x43d   :  { %v553_v25 = vrot.slane %v546_v22, %v552_v19 }
 0x43f   :  { %v560_v26 = vrot.slane %v553_v25, %v552_v19 }
 0x441   :  { %566 = vst.msk [vmem:[#allocation2] sm:$0x3] %vm564_vm1, %v560_v26 }
 0x442   :  { %623 = shalt.err (!%p620_p4)
}
 0x443   :  { %s624_s21 = scalar_lea.hbm %s796_s4, 32 }
 0x444   :  { %p625_p5 = scmp.ne.s32.totalorder %s796_s4, %s624_s21  ;;  %p628_p6 = scmp.lt.u32.totalorder %s624_s21, %s796_s4 }
 0x446   :  { %p630_p7 = pnand %p628_p6, %p625_p5 }
 0x448   :  { %633 = shalt.err (!%p630_p7)
}
 0x449   :  { %576 = dma.vmem_to_hbm [thread:$0]  %s574_s18, 32, %s796_s4, [#allocation3]  }
 0x44a   :  { %634 = dma.done.wait [#allocation3], 32  }
 0x44b   :  { %635 = vsyncadd [#allocation3], 4294967264 }
 0x44c   :  { %580 = vsyncpa [#allocation3], 1 }

</bundles_post_ra>
